<compile_context>
chip_gen: v7x
topology: tpu7x:2x2x1
jax: 0.10.0
libtpu: 0.0.40
codegen_flags: <defaults>
</compile_context>

<pallas_src>
import functools

import jax
import jax.numpy as jnp
from jax.experimental import pallas as pl
from jax.experimental.pallas import tpu as pltpu

STATE_DIM = 3
ACTION_DIM = 1
HIDDEN = 128
OUTPUT_STD = 1.0
EPS = 0.003

K_PAD = 8            # fc1 contraction dim padded 3 -> 8 (b1 folded at column 3)
LANE = 128           # batch lives on lanes; tiles are multiples of 128
MAX_TILE_B = 1024    # (128,1024) f32 activations ~0.5 MiB each -> trivial VMEM


def _round_up(n, m):
    return (n + m - 1) // m * m


def _choose_tiling(batch):
    """Pick a lane-aligned batch tile; >=2 grid steps when batch allows."""
    pad_lane = _round_up(max(batch, 1), LANE)
    if pad_lane <= LANE:
        tile_b = LANE
    elif pad_lane <= 2 * MAX_TILE_B:
        # Split into (at least) two tiles so v7x megacore shards across TCs.
        tile_b = _round_up(pad_lane // 2, LANE)
    else:
        tile_b = MAX_TILE_B
    pad_b = _round_up(pad_lane, tile_b)
    return tile_b, pad_b


def _actor_kernel(xt_ref, w1t_ref, w2t_ref, b2_ref, w3b_ref, o_ref, *,
                  output_std):
    # Feature-major layout: activations are (features, tile_b), batch on lanes.
    xt = xt_ref[...]                                          # (8, TB); row 3 == 1.0

    # fc1 (+ b1 folded into column 3 of W1^T): MXU matmul with K = 8.
    h1 = jnp.dot(w1t_ref[...], xt,
                 preferred_element_type=jnp.float32)          # (H, TB)
    h1 = jnp.maximum(h1, 0.0)

    # fc2: (H, H) @ (H, TB) on the MXU; bias is a (H, 1) column broadcast.
    h2 = jnp.dot(w2t_ref[...], h1,
                 preferred_element_type=jnp.float32)          # (H, TB)
    h2 = jnp.maximum(h2 + b2_ref[...], 0.0)

    # fc3: (1, H) @ (H, TB) -> lane-dense (1, TB); b3 is a scalar splat.
    y = jnp.dot(w3b_ref[0:1, :], h2,
                preferred_element_type=jnp.float32)           # (1, TB)
    y = jnp.tanh(y + w3b_ref[1:2, 0:1])                       # EUP slot
    if output_std != 1.0:                                     # static Python check
        y = output_std * y
    o_ref[...] = y                                            # lane-dense store


def prepare_params(params):
    """One-time conversion to kernel-ready (feature-major) layout."""
    w1, b1, w2, b2, w3, b3 = params
    # W1^T with K padded to 8; column STATE_DIM carries b1 (bias fold).
    w1t_aug = jnp.zeros((HIDDEN, K_PAD), jnp.float32)
    w1t_aug = w1t_aug.at[:, :STATE_DIM].set(w1.T.astype(jnp.float32))
    w1t_aug = w1t_aug.at[:, STATE_DIM].set(b1.astype(jnp.float32))
    # W2^T and b2 as a (H, 1) column.
    w2t = w2.T.astype(jnp.float32)                             # (128, 128)
    b2_col = b2.reshape(HIDDEN, 1).astype(jnp.float32)         # (128, 1)
    # [w3_row ; b3] packed into one (2, 128) slab.
    w3b = jnp.zeros((2, HIDDEN), jnp.float32)
    w3b = w3b.at[0, :].set(w3.reshape(HIDDEN).astype(jnp.float32))
    w3b = w3b.at[1, 0].set(b3.reshape(()).astype(jnp.float32))
    return (w1t_aug, w2t, b2_col, w3b)


def actor_forward(state, kernel_params, *, output_std=OUTPUT_STD):
    """state: (B, STATE_DIM) float32 -> (B, ACTION_DIM) float32."""
    w1t_aug, w2t, b2_col, w3b = kernel_params
    batch = state.shape[0]
    tile_b, pad_b = _choose_tiling(batch)

    # Feature-major input slab: rows 0..2 = state^T, row 3 = ones (b1 fold),
    # rows 4..7 = zeros.  One contiguous (8, tile_b) DMA per grid step.
    x = state.astype(jnp.float32)
    xt = jnp.concatenate(
        [x.T,
         jnp.ones((1, batch), jnp.float32),
         jnp.zeros((K_PAD - STATE_DIM - 1, batch), jnp.float32)],
        axis=0)                                                # (8, batch)
    if pad_b != batch:
        xt = jnp.pad(xt, ((0, 0), (0, pad_b - batch)))

    grid = (pad_b // tile_b,)
    const = lambda i: (0, 0)   # weights: same block every step -> stay resident

    out = pl.pallas_call(
        functools.partial(_actor_kernel, output_std=float(output_std)),
        out_shape=jax.ShapeDtypeStruct((1, pad_b), jnp.float32),
        grid=grid,
        in_specs=[
            pl.BlockSpec((K_PAD, tile_b), lambda i: (0, i)),   # x^T tile
            pl.BlockSpec((HIDDEN, K_PAD), const),              # W1^T (+b1)
            pl.BlockSpec((HIDDEN, HIDDEN), const),             # W2^T
            pl.BlockSpec((HIDDEN, 1), const),                  # b2 column
            pl.BlockSpec((2, HIDDEN), const),                  # [w3 ; b3]
        ],
        out_specs=pl.BlockSpec((1, tile_b), lambda i: (0, i)),  # lane-dense
        compiler_params=pltpu.CompilerParams(
            dimension_semantics=("parallel",)),  # megacore sharding on v7x
    )(xt, w1t_aug, w2t, b2_col, w3b)

    return out.reshape(pad_b, ACTION_DIM)[:batch]


def init_params(key):
    """Deterministic init mirroring Actor_Model.__init__ shapes.

    Weights stored as (in_features, out_features) — transposed vs PyTorch.
    fc1/fc2: Xavier-normal; fc3: uniform(-EPS, EPS); biases: PyTorch default
    uniform(-1/sqrt(fan_in), 1/sqrt(fan_in)).
    """
    k1, k2, k3, kb1, kb2, kb3 = jax.random.split(key, 6)

    def xavier_normal(k, fan_in, fan_out):
        std = (2.0 / (fan_in + fan_out)) ** 0.5
        return std * jax.random.normal(k, (fan_in, fan_out), jnp.float32)

    def bias_uniform(k, fan_in, n):
        bound = 1.0 / (fan_in ** 0.5)
        return jax.random.uniform(k, (n,), jnp.float32, -bound, bound)

    w1 = xavier_normal(k1, STATE_DIM, HIDDEN)
    b1 = bias_uniform(kb1, STATE_DIM, HIDDEN)
    w2 = xavier_normal(k2, HIDDEN, HIDDEN)
    b2 = bias_uniform(kb2, HIDDEN, HIDDEN)
    w3 = jax.random.uniform(k3, (HIDDEN, ACTION_DIM), jnp.float32, -EPS, EPS)
    b3 = bias_uniform(kb3, HIDDEN, ACTION_DIM)
    return (w1, b1, w2, b2, w3, b3)


def actor_reference(state, params, *, output_std=OUTPUT_STD):
    """Pure-JAX reference for correctness check."""
    w1, b1, w2, b2, w3, b3 = params
    h1 = jnp.maximum(state @ w1 + b1, 0.0)
    h2 = jnp.maximum(h1 @ w2 + b2, 0.0)
    return output_std * jnp.tanh(h2 @ w3 + b3)


if __name__ == "__main__":
    key = jax.random.PRNGKey(0)
    pkey, xkey, xkey2 = jax.random.split(key, 3)

    params = init_params(pkey)
    kernel_params = prepare_params(params)   # one-time, reused across calls

    # Small case (module-typical shapes): batch=2, state_dim=3.
    state = jax.random.normal(xkey, (2, STATE_DIM), jnp.float32)
    out = jax.block_until_ready(actor_forward(state, kernel_params))
    ref = actor_reference(state, params)
    assert out.shape == (2, ACTION_DIM), out.shape
    assert jnp.allclose(out, ref, atol=1e-5, rtol=1e-5), (out, ref)

    # Batched case exercising the grid (2 tiles, padding, megacore path).
    state_big = jax.random.normal(xkey2, (384, STATE_DIM), jnp.float32)
    out_big = jax.block_until_ready(actor_forward(state_big, kernel_params))
    ref_big = actor_reference(state_big, params)
    assert out_big.shape == (384, ACTION_DIM), out_big.shape
    assert jnp.allclose(out_big, ref_big, atol=1e-5, rtol=1e-5)

    print("KERNEL_OK")
</pallas_src>

<mosaic_0001>
module attributes {stable_mosaic.version = 11 : i64} {
  func.func @_actor_kernel(%arg0: i32, %arg1: memref<8x128xf32, #tpu.memory_space<vmem>>, %arg2: memref<128x8xf32, #tpu.memory_space<vmem>>, %arg3: memref<128x128xf32, #tpu.memory_space<vmem>>, %arg4: memref<128x1xf32, #tpu.memory_space<vmem>>, %arg5: memref<2x128xf32, #tpu.memory_space<vmem>>, %arg6: memref<1x128xf32, #tpu.memory_space<vmem>>) attributes {dimension_semantics = [#tpu.dimension_semantics<parallel>], iteration_bounds = array<i64: 1>, scalar_prefetch = 0 : i64, scratch_operands = 0 : i64, tpu.core_type = #tpu.core_type<tc>, window_params = [{transform_indices = @transform_0, window_bounds = array<i64: 8, 128>}, {pipeline_mode = #tpu.pipeline_mode<synchronous>, transform_indices = @transform_1, window_bounds = array<i64: 128, 8>}, {pipeline_mode = #tpu.pipeline_mode<synchronous>, transform_indices = @transform_2, window_bounds = array<i64: 128, 128>}, {pipeline_mode = #tpu.pipeline_mode<synchronous>, transform_indices = @transform_3, window_bounds = array<i64: 128, 1>}, {pipeline_mode = #tpu.pipeline_mode<synchronous>, transform_indices = @transform_4, window_bounds = array<i64: 2, 128>}, {transform_indices = @transform_5, window_bounds = array<i64: 1, 128>}]} {
    %c0 = arith.constant 0 : index
    %c0_0 = arith.constant 0 : index
    %0 = vector.load %arg1[%c0, %c0_0] : memref<8x128xf32, #tpu.memory_space<vmem>>, vector<8x128xf32>
    %c0_1 = arith.constant 0 : index
    %c0_2 = arith.constant 0 : index
    %1 = vector.load %arg2[%c0_1, %c0_2] : memref<128x8xf32, #tpu.memory_space<vmem>>, vector<128x8xf32>
    %cst = arith.constant dense<0.000000e+00> : vector<128x128xf32>
    %2 = tpu.matmul %1, %0, %cst {dimension_numbers = #tpu.dot_dimension_numbers<[1], [0], [0], [1], [0, 0, 1, 1], [], []>} : vector<128x8xf32>, vector<8x128xf32>, vector<128x128xf32> -> vector<128x128xf32>
    %cst_3 = arith.constant 0.000000e+00 : f32
    %3 = vector.broadcast %cst_3 : f32 to vector<128x128xf32>
    %4 = arith.maximumf %2, %3 : vector<128x128xf32>
    %c0_4 = arith.constant 0 : index
    %c0_5 = arith.constant 0 : index
    %5 = vector.load %arg3[%c0_4, %c0_5] : memref<128x128xf32, #tpu.memory_space<vmem>>, vector<128x128xf32>
    %cst_6 = arith.constant dense<0.000000e+00> : vector<128x128xf32>
    %6 = tpu.matmul %5, %4, %cst_6 {dimension_numbers = #tpu.dot_dimension_numbers<[1], [0], [0], [1], [0, 0, 1, 1], [], []>} : vector<128x128xf32>, vector<128x128xf32>, vector<128x128xf32> -> vector<128x128xf32>
    %c0_7 = arith.constant 0 : index
    %c0_8 = arith.constant 0 : index
    %7 = vector.load %arg4[%c0_7, %c0_8] : memref<128x1xf32, #tpu.memory_space<vmem>>, vector<128x1xf32>
    %8 = vector.broadcast %7 : vector<128x1xf32> to vector<128x128xf32>
    %9 = arith.addf %6, %8 : vector<128x128xf32>
    %cst_9 = arith.constant 0.000000e+00 : f32
    %10 = vector.broadcast %cst_9 : f32 to vector<128x128xf32>
    %11 = arith.maximumf %9, %10 : vector<128x128xf32>
    %c0_10 = arith.constant 0 : index
    %c0_11 = arith.constant 0 : index
    %12 = vector.load %arg5[%c0_10, %c0_11] : memref<2x128xf32, #tpu.memory_space<vmem>>, vector<1x128xf32>
    %cst_12 = arith.constant dense<0.000000e+00> : vector<1x128xf32>
    %13 = tpu.matmul %12, %11, %cst_12 {dimension_numbers = #tpu.dot_dimension_numbers<[1], [0], [0], [1], [0, 0, 1, 1], [], []>} : vector<1x128xf32>, vector<128x128xf32>, vector<1x128xf32> -> vector<1x128xf32>
    %c1 = arith.constant 1 : index
    %c0_13 = arith.constant 0 : index
    %14 = vector.load %arg5[%c1, %c0_13] : memref<2x128xf32, #tpu.memory_space<vmem>>, vector<1x1xf32>
    %15 = vector.broadcast %14 : vector<1x1xf32> to vector<1x128xf32>
    %16 = arith.addf %13, %15 : vector<1x128xf32>
    %17 = math.tanh %16 : vector<1x128xf32>
    %c0_14 = arith.constant 0 : index
    %c0_15 = arith.constant 0 : index
    %18 = vector.load %arg6[%c0_14, %c0_15] : memref<1x128xf32, #tpu.memory_space<vmem>>, vector<1x128xf32>
    tpu.vector_store %arg6[%c0_14, %c0_15], %17 {strides = array<i32>} : memref<1x128xf32, #tpu.memory_space<vmem>>, vector<1x128xf32>,
    return
  }
  func.func @transform_0(%arg0: i32) -> (i32, i32) {
    %c0_i32 = arith.constant 0 : i32
    %c0_i32_0 = arith.constant 0 : i32
    return %c0_i32, %arg0 : i32, i32
  }
  func.func @transform_1(%arg0: i32) -> (i32, i32) {
    %c0_i32 = arith.constant 0 : i32
    %c0_i32_0 = arith.constant 0 : i32
    %c0_i32_1 = arith.constant 0 : i32
    return %c0_i32, %c0_i32_0 : i32, i32
  }
  func.func @transform_2(%arg0: i32) -> (i32, i32) {
    %c0_i32 = arith.constant 0 : i32
    %c0_i32_0 = arith.constant 0 : i32
    %c0_i32_1 = arith.constant 0 : i32
    return %c0_i32, %c0_i32_0 : i32, i32
  }
  func.func @transform_3(%arg0: i32) -> (i32, i32) {
    %c0_i32 = arith.constant 0 : i32
    %c0_i32_0 = arith.constant 0 : i32
    %c0_i32_1 = arith.constant 0 : i32
    return %c0_i32, %c0_i32_0 : i32, i32
  }
  func.func @transform_4(%arg0: i32) -> (i32, i32) {
    %c0_i32 = arith.constant 0 : i32
    %c0_i32_0 = arith.constant 0 : i32
    %c0_i32_1 = arith.constant 0 : i32
    return %c0_i32, %c0_i32_0 : i32, i32
  }
  func.func @transform_5(%arg0: i32) -> (i32, i32) {
    %c0_i32 = arith.constant 0 : i32
    %c0_i32_0 = arith.constant 0 : i32
    return %c0_i32, %arg0 : i32, i32
  }
}

</mosaic_0001>

<bundles_post_ra>
// kernel: tpu_custom_call.1
= control target key start
LH: loop header
LB: loop body
LE: loop exit
PB: predicated region body
PF: predicated region fallthrough
CT: control target
= control target key end

     0   :  { %vm38_vm0 = vcmask 64512   ;;  %s1126_s0 = inlined_call_operand.vmem [shape: f32[8,128], index: 0, kind: input, shape index: {}]   ;;  %s1127_s1 = inlined_call_operand.vmem [shape: f32[128,8], index: 1, kind: input, shape index: {}]   ;;  %s1128_s2 = inlined_call_operand.vmem [shape: f32[128,128], index: 2, kind: input, shape index: {}]   ;;  %s1129_s3 = inlined_call_operand.vmem [shape: f32[128,1], index: 3, kind: input, shape index: {}]   ;;  %s1130_s4 = inlined_call_operand.vmem [shape: f32[2,128], index: 4, kind: input, shape index: {}]   ;;  %s1131_s5 = inlined_call_operand.hbm [shape: f32[1,128], index: 5, kind: output, shape index: {}]  }
   0x1   :  { %v21_v0 = vld [vmem:[%s1126_s0] sm:$0xff]  ;;  %v23_v2 = vld [vmem:[%s1127_s1 + $0x8] sm:$0xff]  ;;  %v24_v3 = vld [vmem:[%s1127_s1 + $0x10] sm:$0xff] }
   0x2   :  { %v22_v1 = vld [vmem:[%s1127_s1] sm:$0xff]  ;;  %696 = vmatprep.subr.mxu0 %v21_v0  ;;  %v25_v4 = vld [vmem:[%s1127_s1 + $0x18] sm:$0xff] }
   0x3   :  { %698 = vmatprep.mubr.msk.f32.mxu0 %vm38_vm0, %v22_v1  ;;  %697 = vmatpush3.msra.mxu0 %v21_v0  ;;  %v26_v5 = vld [vmem:[%s1127_s1 + $0x20] sm:$0xff] }
   0x4   :  { %699 = vmatmul.mubr.msk.f32.vlgmr.msra.gmra.mrb[0].mxu0 %vm38_vm0, %v23_v2 }
   0x5   :  { %701 = vmatprep.mubr.msk.f32.mxu0 %vm38_vm0, %v24_v3 }
   0x6   :  { %10 = vsyncpa [#allocation3], 0  ;;  %v27_v6 = vld [vmem:[%s1127_s1 + $0x28] sm:$0xff]  ;;  %v28_v7 = vld [vmem:[%s1127_s1 + $0x30] sm:$0xff]  ;;  %v902_v20 = vmov 0   ;;  %vm904_vm1 = vmmov 0  }
   0x7   :  { %v29_v8 = vld [vmem:[%s1127_s1 + $0x38] sm:$0xff]  ;;  %v30_v9 = vld [vmem:[%s1127_s1 + $0x40] sm:$0xff]  ;;  %v31_v10 = vld [vmem:[%s1127_s1 + $0x48] sm:$0xff]  ;;  %874 = vset.pattern.permute.xlu0 %v902_v20  ;;  %875 = vset.pattern.permute.xlu1 %v902_v20  ;;  %s906_s10 = smov [#allocation2]  }
   0x8   :  { %702 = vmatmul.mubr.msk.f32.gmra.mrb[2].mxu0 %vm38_vm0, %v25_v4  ;;  %v32_v11 = vld [vmem:[%s1127_s1 + $0x50] sm:$0xff]  ;;  %v33_v12 = vld [vmem:[%s1127_s1 + $0x58] sm:$0xff]  ;;  %v34_v13 = vld [vmem:[%s1127_s1 + $0x60] sm:$0xff]  ;;  %s606_s11 = sshll.u32 %s906_s10, 4  ;;  %s607_s11 = int_to_ptr.vmem [resolvable:$true] %s606_s11 }
   0x9   :  { %704 = vmatprep.mubr.msk.f32.mxu0 %vm38_vm0, %v26_v5  ;;  %v35_v14 = vld [vmem:[%s1127_s1 + $0x68] sm:$0xff]  ;;  %v36_v15 = vld [vmem:[%s1127_s1 + $0x70] sm:$0xff]  ;;  %v37_v16 = vld [vmem:[%s1127_s1 + $0x78] sm:$0xff]  ;;  %s878_s12 = scalar_lea.vmem %s607_s11, 16  ;;  %s882_s13 = scalar_lea.vmem %s607_s11, 32 }
   0xa   :  { %v248_v17 = vld [vmem:[%s1128_s2] sm:$0xff]  ;;  %v266_v19 = vld [vmem:[%s1129_s3 + $0x10] sm:$0xff]  ;;  %v265_v21 = vld [vmem:[%s1129_s3 + $0x8] sm:$0xff]  ;;  %p879_p0 = scmp.ne.s32.totalorder %s607_s11, %s878_s12  ;;  %p883_p1 = scmp.lt.s32.totalorder %s607_s11, %s607_s11 }
   0xb   :  { %754 = vmatprep.mubr.f32.mxu1 %v248_v17  ;;  %v264_v18 = vld [vmem:[%s1129_s3] sm:$0xff]  ;;  %292 = vperm.xlu1 %875, %v266_v19   ;;  %v267_v22 = vld [vmem:[%s1129_s3 + $0x18] sm:$0xff]  ;;  %v269_v24 = vld [vmem:[%s1129_s3 + $0x28] sm:$0xff]  ;;  %p884_p2 = scmp.lt.s32.totalorder %s882_s13, %s878_s12 }
   0xc   :  { %705 = vmatmul.mubr.msk.f32.gmra.mrb[4].mxu0 %vm38_vm0, %v27_v6  ;;  %282 = vperm.xlu0 %874, %v264_v18   ;;  %v268_v23 = vld [vmem:[%s1129_s3 + $0x20] sm:$0xff]  ;;  %v270_v25 = vld [vmem:[%s1129_s3 + $0x30] sm:$0xff]  ;;  %v271_v26 = vld [vmem:[%s1129_s3 + $0x38] sm:$0xff] }
   0xd   :  { %707 = vmatprep.mubr.msk.f32.mxu0 %vm38_vm0, %v28_v7  ;;  %v272_v27 = vld [vmem:[%s1129_s3 + $0x40] sm:$0xff]  ;;  %v273_v28 = vld [vmem:[%s1129_s3 + $0x48] sm:$0xff]  ;;  %v274_v29 = vld [vmem:[%s1129_s3 + $0x50] sm:$0xff]  ;;  %p885_p3 = por %p884_p2, %p883_p1 }
   0xe   :  { %v275_v30 = vld [vmem:[%s1129_s3 + $0x58] sm:$0xff]  ;;  %v276_v31 = vld [vmem:[%s1129_s3 + $0x60] sm:$0xff]  ;;  %v277_v32 = vld [vmem:[%s1129_s3 + $0x68] sm:$0xff] }
   0xf   :  { %297 = vperm.xlu1 %875, %v267_v22   ;;  %v278_v33 = vld [vmem:[%s1129_s3 + $0x70] sm:$0xff]  ;;  %v279_v34 = vld [vmem:[%s1129_s3 + $0x78] sm:$0xff]  ;;  %v522_v35 = vld [vmem:[%s1130_s4 + $0x1] sm:$0x1]  ;;  %p886_p4 = pnand %p885_p3, %p879_p0 }
  0x10   :  { %708 = vmatmul.mubr.msk.f32.gmra.mrb[6].mxu0 %vm38_vm0, %v29_v8  ;;  %287 = vperm.xlu0 %874, %v265_v21   ;;  %v254_v17 = vld [vmem:[%s1128_s2 + $0x30] sm:$0xff]  ;;  %v255_v18 = vld [vmem:[%s1128_s2 + $0x38] sm:$0xff]  ;;  %v256_v19 = vld [vmem:[%s1128_s2 + $0x40] sm:$0xff] }
  0x11   :  { %710 = vmatprep.mubr.msk.f32.mxu0 %vm38_vm0, %v30_v9  ;;  %v257_v20 = vld [vmem:[%s1128_s2 + $0x48] sm:$0xff]  ;;  %v258_v21 = vld [vmem:[%s1128_s2 + $0x50] sm:$0xff]  ;;  %v259_v22 = vld [vmem:[%s1128_s2 + $0x58] sm:$0xff] }
  0x13   :  { %307 = vperm.xlu1 %875, %v269_v24   ;;  %v261_v24 = vld [vmem:[%s1128_s2 + $0x68] sm:$0xff] }
  0x14   :  { %711 = vmatmul.mubr.msk.f32.gmra.mrb[8].mxu0 %vm38_vm0, %v31_v10  ;;  %302 = vperm.xlu0 %874, %v268_v23   ;;  %v260_v23 = vld [vmem:[%s1128_s2 + $0x60] sm:$0xff] }
  0x15   :  { %713 = vmatprep.mubr.msk.f32.mxu0 %vm38_vm0, %v32_v11 }
  0x17   :  { %317 = vperm.xlu1 %875, %v271_v26   ;;  %v263_v26 = vld [vmem:[%s1128_s2 + $0x78] sm:$0xff] }
  0x18   :  { %714 = vmatmul.mubr.msk.f32.gmra.mrb[10].mxu0 %vm38_vm0, %v33_v12  ;;  %312 = vperm.xlu0 %874, %v270_v25   ;;  %v249_v12 = vld [vmem:[%s1128_s2 + $0x8] sm:$0xff]  ;;  %v262_v25 = vld [vmem:[%s1128_s2 + $0x70] sm:$0xff] }
  0x19   :  { %716 = vmatprep.mubr.msk.f32.mxu0 %vm38_vm0, %v34_v13  ;;  %v250_v13 = vld [vmem:[%s1128_s2 + $0x10] sm:$0xff] }
  0x1b   :  { %327 = vperm.xlu1 %875, %v273_v28   ;;  %v905_v28 = vmov 0.0  }
  0x1c   :  { %717 = vmatmul.mubr.msk.f32.gmra.mrb[12].mxu0 %vm38_vm0, %v35_v14  ;;  %322 = vperm.xlu0 %874, %v272_v27   ;;  %v251_v14 = vld [vmem:[%s1128_s2 + $0x18] sm:$0xff]  ;;  %v903_v27 = vmov 0.0|0.0  }
  0x1d   :  { %719 = vmatprep.mubr.msk.f32.mxu0 %vm38_vm0, %v36_v15  ;;  %v252_v15 = vld [vmem:[%s1128_s2 + $0x20] sm:$0xff]  ;;  %845 = vmatprep.subr.bf16.mxu0 %v903_v27 }
  0x1f   :  { %337 = vperm.xlu1 %875, %v275_v30  }
  0x20   :  { %720 = vmatmul.mubr.msk.f32.gmra.mrb[14].mxu0 %vm38_vm0, %v37_v16  ;;  %332 = vperm.xlu0 %874, %v274_v29   ;;  %v253_v16 = vld [vmem:[%s1128_s2 + $0x28] sm:$0xff] }
  0x21   :  { %810 = vmatprep.mubr.msk.f32.mxu0 %vm904_vm1, %v905_v28 }
  0x23   :  { %347 = vperm.xlu1 %875, %v277_v32  }
  0x24   :  { %342 = vperm.xlu0 %874, %v276_v31  }
  0x27   :  { %357 = vperm.xlu1 %875, %v279_v34  }
  0x28   :  { %352 = vperm.xlu0 %874, %v278_v33  }
  0x2c   :  { %525 = vperm.xlu0 %874, %v522_v35  }
  0x8a   :  { %v293_v29 = vpop.permute.xlu1 %292 }
  0x8b   :  { %v283_v30 = vpop.permute.xlu0 %282 }
  0x8e   :  { %v298_v31 = vpop.permute.xlu1 %297 }
  0x8f   :  { %v288_v32 = vpop.permute.xlu0 %287 }
  0x92   :  { %v308_v33 = vpop.permute.xlu1 %307 }
  0x93   :  { %v303_v34 = vpop.permute.xlu0 %302 }
  0xd7   :  { %v700_v36 = vpop.f32.mrb[0].mxu0 }
  0xd8   :  { %v233_v37 = vmax.f32 %v700_v36, 0.0  ;;  %v153_v38 = vpop.f32.mrb[1].mxu0 }
  0xd9   :  { %v232_v39 = vmax.f32 %v153_v38, 0.0 }
  0xdb   :  { %v703_v40 = vpop.f32.mrb[2].mxu0  ;;  %v813_v41 = vpack.c.bf16 %v233_v37, %v232_v39 }
  0xdc   :  { %v235_v42 = vmax.f32 %v703_v40, 0.0  ;;  %v163_v43 = vpop.f32.mrb[3].mxu0  ;;  %v318_v40 = vpop.permute.xlu1 %317 }
  0xdd   :  { %v234_v44 = vmax.f32 %v163_v43, 0.0  ;;  %814 = vmatprep.subr.bf16.mxu1 %v813_v41  ;;  %v313_v43 = vpop.permute.xlu0 %312 }
  0xde   :  { %816 = vmatpush3.bf16.msra.mxu1 %v813_v41 }
  0xdf   :  { %v817_v45 = vpack.c.bf16 %v235_v42, %v234_v44  ;;  %v706_v46 = vpop.f32.mrb[4].mxu0 }
  0xe0   :  { %v237_v47 = vmax.f32 %v706_v46, 0.0  ;;  %v173_v48 = vpop.f32.mrb[5].mxu0 }
  0xe1   :  { %v236_v49 = vmax.f32 %v173_v48, 0.0  ;;  %818 = vmatprep.subr.bf16.mxu1 %v817_v45 }
  0xe2   :  { %820 = vmatpush3.bf16.msra.mxu1 %v817_v45 }
  0xe3   :  { %v821_v50 = vpack.c.bf16 %v237_v47, %v236_v49  ;;  %v709_v51 = vpop.f32.mrb[6].mxu0 }
  0xe4   :  { %v239_v52 = vmax.f32 %v709_v51, 0.0  ;;  %v183_v53 = vpop.f32.mrb[7].mxu0 }
  0xe5   :  { %v238_v54 = vmax.f32 %v183_v53, 0.0  ;;  %822 = vmatprep.subr.bf16.mxu1 %v821_v50  ;;  %v328_v53 = vpop.permute.xlu1 %327 }
  0xe6   :  { %824 = vmatpush3.bf16.msra.mxu1 %v821_v50 }
  0xe7   :  { %v825_v55 = vpack.c.bf16 %v239_v52, %v238_v54  ;;  %v712_v56 = vpop.f32.mrb[8].mxu0 }
  0xe8   :  { %v241_v57 = vmax.f32 %v712_v56, 0.0  ;;  %v193_v58 = vpop.f32.mrb[9].mxu0  ;;  %v323_v56 = vpop.permute.xlu0 %322 }
  0xe9   :  { %v240_v59 = vmax.f32 %v193_v58, 0.0  ;;  %826 = vmatprep.subr.bf16.mxu1 %v825_v55 }
  0xea   :  { %828 = vmatpush3.bf16.msra.mxu1 %v825_v55 }
  0xeb   :  { %v829_v60 = vpack.c.bf16 %v241_v57, %v240_v59  ;;  %v715_v61 = vpop.f32.mrb[10].mxu0 }
  0xec   :  { %v243_v62 = vmax.f32 %v715_v61, 0.0  ;;  %v203_v63 = vpop.f32.mrb[11].mxu0 }
  0xed   :  { %v242_v0 = vmax.f32 %v203_v63, 0.0  ;;  %830 = vmatprep.subr.bf16.mxu1 %v829_v60 }
  0xee   :  { %832 = vmatpush3.bf16.msra.mxu1 %v829_v60 }
  0xef   :  { %v833_v1 = vpack.c.bf16 %v243_v62, %v242_v0  ;;  %v718_v2 = vpop.f32.mrb[12].mxu0 }
  0xf0   :  { %v245_v3 = vmax.f32 %v718_v2, 0.0  ;;  %v213_v4 = vpop.f32.mrb[13].mxu0 }
  0xf1   :  { %v244_v5 = vmax.f32 %v213_v4, 0.0  ;;  %834 = vmatprep.subr.bf16.mxu1 %v833_v1  ;;  %v333_v4 = vpop.permute.xlu0 %332 }
  0xf2   :  { %836 = vmatpush3.bf16.msra.mxu1 %v833_v1  ;;  %v338_v1 = vpop.permute.xlu1 %337 }
  0xf3   :  { %v837_v6 = vpack.c.bf16 %v245_v3, %v244_v5  ;;  %v721_v7 = vpop.f32.mrb[14].mxu0 }
  0xf4   :  { %v247_v8 = vmax.f32 %v721_v7, 0.0  ;;  %v223_v9 = vpop.f32.mrb[15].mxu0 }
  0xf5   :  { %v246_v10 = vmax.f32 %v223_v9, 0.0  ;;  %838 = vmatprep.subr.bf16.mxu1 %v837_v6 }
  0xf6   :  { %840 = vmatpush3.bf16.msra.mxu1 %v837_v6 }
  0xf7   :  { %v841_v11 = vpack.c.bf16 %v247_v8, %v246_v10 }
  0xf9   :  { %842 = vmatprep.subr.bf16.mxu1 %v841_v11 }
  0xfa   :  { %844 = vmatpush3.bf16.msra.mxu1 %v841_v11 }
  0xfd   :  { %755 = vmatmul.mubr.f32.vlgmr.msra.gmra.mrb[0].mxu1 %v249_v12 }
  0xfe   :  { %757 = vmatprep.mubr.f32.mxu1 %v250_v13 }
 0x101   :  { %758 = vmatmul.mubr.f32.gmra.mrb[2].mxu1 %v251_v14  ;;  %v348_v14 = vpop.permute.xlu1 %347 }
 0x102   :  { %760 = vmatprep.mubr.f32.mxu1 %v252_v15 }
 0x105   :  { %761 = vmatmul.mubr.f32.gmra.mrb[4].mxu1 %v253_v16 }
 0x106   :  { %763 = vmatprep.mubr.f32.mxu1 %v254_v17  ;;  %v343_v17 = vpop.permute.xlu0 %342 }
 0x109   :  { %764 = vmatmul.mubr.f32.gmra.mrb[6].mxu1 %v255_v18 }
 0x10a   :  { %766 = vmatprep.mubr.f32.mxu1 %v256_v19 }
 0x10d   :  { %767 = vmatmul.mubr.f32.gmra.mrb[8].mxu1 %v257_v20 }
 0x10e   :  { %769 = vmatprep.mubr.f32.mxu1 %v258_v21 }
 0x111   :  { %770 = vmatmul.mubr.f32.gmra.mrb[10].mxu1 %v259_v22 }
 0x112   :  { %772 = vmatprep.mubr.f32.mxu1 %v260_v23 }
 0x115   :  { %773 = vmatmul.mubr.f32.gmra.mrb[12].mxu1 %v261_v24 }
 0x116   :  { %775 = vmatprep.mubr.f32.mxu1 %v262_v25 }
 0x119   :  { %776 = vmatmul.mubr.f32.gmra.mrb[14].mxu1 %v263_v26  ;;  %v358_v26 = vpop.permute.xlu1 %357 }
 0x1d0   :  { %v756_v35 = vpop.f32.mrb[0].mxu1 }
 0x1d1   :  { %v432_v36 = vadd.f32 %v756_v35, %v288_v32  ;;  %v426_v37 = vpop.f32.mrb[1].mxu1 }
 0x1d2   :  { %v427_v38 = vadd.f32 %v426_v37, %v283_v30  ;;  %v353_v30 = vpop.permute.xlu0 %352 }
 0x1d3   :  { %v506_v39 = vmax.f32 %v432_v36, 0.0 }
 0x1d4   :  { %v505_v41 = vmax.f32 %v427_v38, 0.0  ;;  %v759_v42 = vpop.f32.mrb[2].mxu1  ;;  %v521_v38 = vld [vmem:[%s1130_s4] sm:$0x1] }
 0x1d5   :  { %v442_v44 = vadd.f32 %v759_v42, %v298_v31  ;;  %v436_v45 = vpop.f32.mrb[3].mxu1 }
 0x1d6   :  { %v846_v46 = vpack.c.bf16 %v506_v39, %v505_v41  ;;  %v437_v47 = vadd.f32 %v436_v45, %v293_v29  ;;  %v526_v39 = vpop.permute.xlu0 %525 }
 0x1d7   :  { %v508_v48 = vmax.f32 %v442_v44, 0.0 }
 0x1d8   :  { %v507_v49 = vmax.f32 %v437_v47, 0.0  ;;  %v762_v50 = vpop.f32.mrb[4].mxu1  ;;  %847 = vmatpush3.bf16.msra.mxu0 %v846_v46 }
 0x1d9   :  { %v452_v51 = vadd.f32 %v762_v50, %v308_v33  ;;  %v446_v52 = vpop.f32.mrb[5].mxu1  ;;  %848 = vmatprep.subr.bf16.mxu0 %v903_v27 }
 0x1da   :  { %v849_v54 = vpack.c.bf16 %v508_v48, %v507_v49  ;;  %v447_v55 = vadd.f32 %v446_v52, %v303_v34 }
 0x1db   :  { %v510_v57 = vmax.f32 %v452_v51, 0.0 }
 0x1dc   :  { %v509_v58 = vmax.f32 %v447_v55, 0.0  ;;  %v765_v59 = vpop.f32.mrb[6].mxu1  ;;  %850 = vmatpush3.bf16.msra.mxu0 %v849_v54 }
 0x1dd   :  { %v462_v60 = vadd.f32 %v765_v59, %v318_v40  ;;  %v456_v61 = vpop.f32.mrb[7].mxu1  ;;  %851 = vmatprep.subr.bf16.mxu0 %v903_v27 }
 0x1de   :  { %v852_v62 = vpack.c.bf16 %v510_v57, %v509_v58  ;;  %v457_v63 = vadd.f32 %v456_v61, %v313_v43 }
 0x1df   :  { %v512_v0 = vmax.f32 %v462_v60, 0.0 }
 0x1e0   :  { %v511_v2 = vmax.f32 %v457_v63, 0.0  ;;  %v768_v3 = vpop.f32.mrb[8].mxu1  ;;  %853 = vmatpush3.bf16.msra.mxu0 %v852_v62 }
 0x1e1   :  { %v472_v5 = vadd.f32 %v768_v3, %v328_v53  ;;  %v466_v6 = vpop.f32.mrb[9].mxu1  ;;  %854 = vmatprep.subr.bf16.mxu0 %v903_v27 }
 0x1e2   :  { %v855_v7 = vpack.c.bf16 %v512_v0, %v511_v2  ;;  %v467_v8 = vadd.f32 %v466_v6, %v323_v56 }
 0x1e3   :  { %v514_v9 = vmax.f32 %v472_v5, 0.0 }
 0x1e4   :  { %v513_v10 = vmax.f32 %v467_v8, 0.0  ;;  %v771_v11 = vpop.f32.mrb[10].mxu1  ;;  %856 = vmatpush3.bf16.msra.mxu0 %v855_v7 }
 0x1e5   :  { %v482_v12 = vadd.f32 %v771_v11, %v338_v1  ;;  %v476_v13 = vpop.f32.mrb[11].mxu1  ;;  %857 = vmatprep.subr.bf16.mxu0 %v903_v27 }
 0x1e6   :  { %v858_v15 = vpack.c.bf16 %v514_v9, %v513_v10  ;;  %v477_v16 = vadd.f32 %v476_v13, %v333_v4 }
 0x1e7   :  { %v516_v18 = vmax.f32 %v482_v12, 0.0 }
 0x1e8   :  { %v515_v19 = vmax.f32 %v477_v16, 0.0  ;;  %v774_v20 = vpop.f32.mrb[12].mxu1  ;;  %859 = vmatpush3.bf16.msra.mxu0 %v858_v15 }
 0x1e9   :  { %v492_v21 = vadd.f32 %v774_v20, %v348_v14  ;;  %v486_v22 = vpop.f32.mrb[13].mxu1  ;;  %860 = vmatprep.subr.bf16.mxu0 %v903_v27 }
 0x1ea   :  { %v861_v23 = vpack.c.bf16 %v516_v18, %v515_v19  ;;  %v487_v24 = vadd.f32 %v486_v22, %v343_v17 }
 0x1eb   :  { %v518_v25 = vmax.f32 %v492_v21, 0.0 }
 0x1ec   :  { %v517_v28 = vmax.f32 %v487_v24, 0.0  ;;  %v777_v29 = vpop.f32.mrb[14].mxu1  ;;  %862 = vmatpush3.bf16.msra.mxu0 %v861_v23 }
 0x1ed   :  { %v502_v31 = vadd.f32 %v777_v29, %v358_v26  ;;  %v496_v32 = vpop.f32.mrb[15].mxu1  ;;  %863 = vmatprep.subr.bf16.mxu0 %v903_v27 }
 0x1ee   :  { %v864_v33 = vpack.c.bf16 %v518_v25, %v517_v28  ;;  %v497_v34 = vadd.f32 %v496_v32, %v353_v30 }
 0x1ef   :  { %v520_v35 = vmax.f32 %v502_v31, 0.0 }
 0x1f0   :  { %v519_v36 = vmax.f32 %v497_v34, 0.0  ;;  %865 = vmatpush3.bf16.msra.mxu0 %v864_v33 }
 0x1f1   :  { %866 = vmatprep.subr.bf16.mxu0 %v903_v27 }
 0x1f2   :  { %v867_v37 = vpack.c.bf16 %v520_v35, %v519_v36 }
 0x1f4   :  { %868 = vmatpush3.bf16.msra.mxu0 %v867_v37 }
 0x1f7   :  { %811 = vmatmul.mubr.f32.vlgmr.msra.gmra.mrb[16].mxu0 %v521_v38 }
 0x2ca   :  { %v594_v40 = vpop.f32.mrb[16].mxu0 }
 0x2cb   :  { %v595_v41 = vadd.f32 %v594_v40, %v526_v39  ;;  %v812_v42 = vpop.f32.mrb[17].mxu0 }
 0x2cd   :  { %876 = vtanh.f32 %v595_v41 }
 0x2d7   :  { %v877_v43 = vpop.eup %876 }
 0x2d8   :  { %599 = vst [vmem:[#allocation2] sm:$0x1] %v877_v43 }
 0x2d9   :  { %889 = shalt.err (!%p886_p4)
}
 0x2da   :  { %s890_s15 = scalar_lea.hbm %s1131_s5, 16 }
 0x2db   :  { %p891_p5 = scmp.ne.s32.totalorder %s1131_s5, %s890_s15  ;;  %p894_p6 = scmp.lt.u32.totalorder %s890_s15, %s1131_s5 }
 0x2dd   :  { %p896_p7 = pnand %p894_p6, %p891_p5 }
 0x2df   :  { %899 = shalt.err (!%p896_p7)
}
 0x2e0   :  { %609 = dma.vmem_to_hbm [thread:$0]  %s607_s11, 16, %s1131_s5, [#allocation3]  }
 0x2e1   :  { %900 = dma.done.wait [#allocation3], 16  }
 0x2e2   :  { %901 = vsyncadd [#allocation3], 4294967280 }
 0x2e3   :  { %613 = vsyncpa [#allocation3], 1 }

</bundles_post_ra>
